<compile_context>
chip_gen: v7x
topology: tpu7x:2x2x1
jax: 0.10.0
libtpu: 0.0.40
codegen_flags: <defaults>
</compile_context>

<pallas_src>
import functools

import jax
import jax.numpy as jnp
from jax import lax
from jax.experimental import pallas as pl
from jax.experimental.pallas import tpu as pltpu


def _w2v_fused_kernel(x_ref, w_ref, wt_ref, out_ref, hid_ref, m_ref, l_ref,
                      *, compute_dtype):
    """Fused hidden / logits / softmax.

    Grid: (batch_tile, phase, vocab_tile)
      phase 0: hid += X_tile @ W_tile^T             (vocab-tile reduction)
      phase 1: s = hid @ WT_tile^T, stage s into the resident output block,
               update online-softmax stats; at the last tile normalize the
               whole block in place with exp(s - m - log l).
    """
    p = pl.program_id(1)
    j = pl.program_id(2)
    nvt = pl.num_programs(2)
    tv = wt_ref.shape[0]

    @pl.when(p == 0)
    def _hidden():
        @pl.when(j == 0)
        def _init():
            hid_ref[...] = jnp.zeros_like(hid_ref)

        # [tb, tv] x [E, tv] -> [tb, E]; contract the vocab-tile axis directly
        # on the MXU, no transpose materialized. Per-tile cast to bf16 (no-op
        # if the caller already passes bf16).
        hid_ref[...] += lax.dot_general(
            x_ref[...].astype(compute_dtype),
            w_ref[...].astype(compute_dtype),
            dimension_numbers=(((1,), (1,)), ((), ())),
            preferred_element_type=jnp.float32)

    @pl.when(p == 1)
    def _logits_softmax():
        @pl.when(j == 0)
        def _init():
            m_ref[...] = jnp.full_like(m_ref, -jnp.inf)
            l_ref[...] = jnp.zeros_like(l_ref)

        # [tb, E] x [tv, E] -> [tb, tv]; contract the embedding axis.
        s = lax.dot_general(
            hid_ref[...].astype(compute_dtype),
            wt_ref[...].astype(compute_dtype),
            dimension_numbers=(((1,), (1,)), ((), ())),
            preferred_element_type=jnp.float32)

        # Stage the raw logits into the VMEM-resident output row block
        # (lane-dense, tv is a multiple of 128 so stores are unmasked).
        col = pl.multiple_of(j * tv, 128)
        out_ref[:, pl.ds(col, tv)] = s.astype(out_ref.dtype)

        # Online softmax statistics (all f32 math).
        m_prev = m_ref[...]
        m_new = jnp.maximum(m_prev, jnp.max(s, axis=1, keepdims=True))
        l_ref[...] = l_ref[...] * jnp.exp(m_prev - m_new) + jnp.sum(
            jnp.exp(s - m_new), axis=1, keepdims=True)
        m_ref[...] = m_new

        @pl.when(j == nvt - 1)
        def _normalize():
            # softmax = exp(s - m - log l): normalization folded into the EUP
            # exp (no VALU divide); m + log(l) computed exactly once.
            shift = m_ref[...] + jnp.log(l_ref[...])
            out_ref[...] = jnp.exp(
                out_ref[...].astype(jnp.float32) - shift).astype(out_ref.dtype)


def _pick_tile(total, target, quantum):
    """Largest multiple of `quantum` dividing `total`, capped at `target`.

    If `total` is not a multiple of `quantum`, the full extent (always a legal
    Pallas block) is used.
    """
    if total % quantum != 0:
        return total
    target = max(quantum, min(target, total))
    best = quantum
    t = quantum
    while t <= target:
        if total % t == 0:
            best = t
        t += quantum
    return best


def word2vec_forward(x, w, wt, *, tv_target=2048, tb_target=256,
                     compute_dtype=jnp.bfloat16, out_dtype=jnp.float32,
                     vmem_limit_bytes=48 * 1024 * 1024):
    """Forward pass of Word2Vec (skip-gram, softmax).

    x:  [B, V]  dense (typically one-hot) input
    w:  [E, V]  == nn.Linear(vocab, embed).weight  (pre-cast to bf16 if cached)
    wt: [V, E]  == nn.Linear(embed, vocab).weight  (pre-cast to bf16 if cached)
    returns softmax(hidden @ wt.T, axis=1) with hidden = x @ w.T, as
    `out_dtype` (pass jnp.bfloat16 to also halve the [B, V] writeback when the
    consumer tolerates it).

    vmem_limit_bytes defaults to 48 MiB so the resident set fits v7x's 64 MiB
    VMEM; on v5e/v6e (128 MiB) raise it toward ~112 MiB and enlarge
    tv_target / tb_target.
    """
    B, V = x.shape
    E = w.shape[0]
    assert w.shape == (E, V) and wt.shape == (V, E)

    # --- tile selection -------------------------------------------------------
    # tb: multiple of 8 sublanes (prefer >=16 for bf16 packing, multiples of
    # 256 fill the v6e/v7x MXU); tv: multiple of 128 lanes.  Keep nbt >= 2
    # where B allows so the "parallel" batch axis shards across both v7x TCs.
    tv = _pick_tile(V, tv_target, 128)
    tb = _pick_tile(B, tb_target, 8)

    out_bytes = jnp.dtype(out_dtype).itemsize

    def resident_bytes(tb_, tv_):
        return (tb_ * V * out_bytes                       # resident output rows
                + tb_ * E * 4                             # hidden accumulator
                + 2 * tb_ * tv_ * x.dtype.itemsize        # X tiles (double buffered)
                + 2 * E * tv_ * w.dtype.itemsize          # W tiles (double buffered)
                + 2 * tv_ * E * wt.dtype.itemsize)        # WT tiles (double buffered)

    budget = int(vmem_limit_bytes * 0.9)
    while resident_bytes(tb, tv) > budget:
        if tv > 128 and tv % 256 == 0:          # halving keeps a multiple of 128
            tv //= 2
        elif tb > 8 and tb % 16 == 0:           # halving keeps a multiple of 8
            tb //= 2
        else:
            # TODO(synk): fall back to a two-phase (recompute-logits) softmax
            # when even the minimal single-pass resident set exceeds VMEM
            # (very large vocabularies).
            raise ValueError("single-pass resident set does not fit the VMEM "
                             "budget; reduce tiles or raise vmem_limit_bytes")

    nbt, nvt = B // tb, V // tv

    kernel = functools.partial(_w2v_fused_kernel, compute_dtype=compute_dtype)

    return pl.pallas_call(
        kernel,
        out_shape=jax.ShapeDtypeStruct((B, V), out_dtype),
        grid_spec=pltpu.PrefetchScalarGridSpec(
            num_scalar_prefetch=0,
            grid=(nbt, 2, nvt),
            in_specs=[
                # X / W tiles stream during phase 0 and stay pinned (no
                # re-DMA) during phase 1.
                pl.BlockSpec((tb, tv), lambda b, p, j: (b, (1 - p) * j)),
                pl.BlockSpec((E, tv), lambda b, p, j: (0, (1 - p) * j)),
                # WT tiles pinned during phase 0, streamed once during phase 1.
                # (If the per-step DMA shows up exposed on v5e, add
                #  pipeline_mode=pl.Buffered(3) here.)
                pl.BlockSpec((tv, E), lambda b, p, j: (p * j, 0)),
            ],
            # Whole (tb, V) output row block stays VMEM-resident across the
            # (phase, vocab) loop; it is only flushed when the batch tile
            # advances, after the in-place normalize has made it valid.
            out_specs=pl.BlockSpec((tb, V), lambda b, p, j: (b, 0)),
            scratch_shapes=[
                pltpu.VMEM((tb, E), jnp.float32),   # hidden accumulator
                pltpu.VMEM((tb, 1), jnp.float32),   # running max m
                pltpu.VMEM((tb, 1), jnp.float32),   # running sum-exp l
            ],
        ),
        compiler_params=pltpu.CompilerParams(
            dimension_semantics=("parallel", "arbitrary", "arbitrary"),
            vmem_limit_bytes=vmem_limit_bytes),
    )(x, w, wt)


def reference_forward(x, w, wt, compute_dtype=jnp.bfloat16):
    """Pure-JAX reference using the same mixed-precision path as the kernel."""
    xc = x.astype(compute_dtype)
    wc = w.astype(compute_dtype)
    wtc = wt.astype(compute_dtype)
    hidden = lax.dot_general(
        xc, wc, dimension_numbers=(((1,), (1,)), ((), ())),
        preferred_element_type=jnp.float32).astype(compute_dtype)
    logits = lax.dot_general(
        hidden, wtc, dimension_numbers=(((1,), (1,)), ((), ())),
        preferred_element_type=jnp.float32)
    return jax.nn.softmax(logits, axis=1)


if __name__ == "__main__":
    # Small but multi-tile shapes: batch=8, vocab=512, embedding=128.
    batch_size = 8
    vocab_size = 512
    embedding_size = 128

    key = jax.random.PRNGKey(0)
    k_idx, k_w, k_wt = jax.random.split(key, 3)

    # One-hot skip-gram center words (dense input, matching nn.Linear usage).
    idx = jax.random.randint(k_idx, (batch_size,), 0, vocab_size)
    x = jax.nn.one_hot(idx, vocab_size, dtype=jnp.float32)

    w = jax.random.normal(k_w, (embedding_size, vocab_size), dtype=jnp.float32) * 0.1
    wt = jax.random.normal(k_wt, (vocab_size, embedding_size), dtype=jnp.float32) * 0.1

    # Weights pre-cast & cached in bf16 once, OUTSIDE the per-call path (no
    # wrapper-side astype round trip); X stays f32 and is cast per tile
    # inside the kernel.
    w_bf16 = w.astype(jnp.bfloat16)
    wt_bf16 = wt.astype(jnp.bfloat16)

    # tv_target=128 -> 4 vocab tiles, exercising the fused two-phase grid and
    # the single-pass online softmax.
    out = word2vec_forward(x, w_bf16, wt_bf16, tv_target=128)
    out = jax.block_until_ready(out)

    ref = reference_forward(x, w, wt)
    assert out.shape == (batch_size, vocab_size)
    assert jnp.allclose(out, ref, atol=1e-5, rtol=1e-4), "mismatch vs JAX reference"
    # softmax rows sum to 1
    assert jnp.allclose(jnp.sum(out, axis=1), 1.0, atol=1e-4)

    print("KERNEL_OK")
</pallas_src>

<mosaic_0001>
module attributes {stable_mosaic.version = 11 : i64} {
  func.func @_w2v_fused_kernel(%arg0: i32, %arg1: i32, %arg2: i32, %arg3: memref<8x128xf32, #tpu.memory_space<vmem>>, %arg4: memref<128x128xbf16, #tpu.memory_space<vmem>>, %arg5: memref<128x128xbf16, #tpu.memory_space<vmem>>, %arg6: memref<8x512xf32, #tpu.memory_space<vmem>>, %arg7: memref<8x128xf32, #tpu.memory_space<vmem>>, %arg8: memref<8x1xf32, #tpu.memory_space<vmem>>, %arg9: memref<8x1xf32, #tpu.memory_space<vmem>>) attributes {dimension_semantics = [#tpu.dimension_semantics<parallel>, #tpu.dimension_semantics<arbitrary>, #tpu.dimension_semantics<arbitrary>], iteration_bounds = array<i64: 1, 2, 4>, scalar_prefetch = 0 : i64, scratch_operands = 3 : i64, tpu.core_type = #tpu.core_type<tc>, window_params = [{transform_indices = @transform_0, window_bounds = array<i64: 8, 128>}, {transform_indices = @transform_1, window_bounds = array<i64: 128, 128>}, {transform_indices = @transform_2, window_bounds = array<i64: 128, 128>}, {transform_indices = @transform_3, window_bounds = array<i64: 8, 512>}]} {
    %c0_i32 = arith.constant 0 : i32
    %0 = arith.cmpi eq, %arg1, %c0_i32 : i32
    %1 = arith.extui %0 : i1 to i32
    %c0_i32_0 = arith.constant 0 : i32
    %2 = arith.cmpi ne, %1, %c0_i32_0 : i32
    scf.if %2 {
      %c0_i32_2 = arith.constant 0 : i32
      %6 = arith.cmpi eq, %arg2, %c0_i32_2 : i32
      %7 = arith.extui %6 : i1 to i32
      %c0_i32_3 = arith.constant 0 : i32
      %8 = arith.cmpi ne, %7, %c0_i32_3 : i32
      scf.if %8 {
        %cst_11 = arith.constant 0.000000e+00 : f32
        %16 = vector.broadcast %cst_11 : f32 to vector<8x128xf32>
        %c0_12 = arith.constant 0 : index
        %c0_13 = arith.constant 0 : index
        %17 = vector.load %arg7[%c0_12, %c0_13] : memref<8x128xf32, #tpu.memory_space<vmem>>, vector<8x128xf32>
        tpu.vector_store %arg7[%c0_12, %c0_13], %16 {strides = array<i32>} : memref<8x128xf32, #tpu.memory_space<vmem>>, vector<8x128xf32>,
      } else {
      }
      %c0 = arith.constant 0 : index
      %c0_4 = arith.constant 0 : index
      %9 = vector.load %arg7[%c0, %c0_4] : memref<8x128xf32, #tpu.memory_space<vmem>>, vector<8x128xf32>
      %c0_5 = arith.constant 0 : index
      %c0_6 = arith.constant 0 : index
      %10 = vector.load %arg3[%c0_5, %c0_6] : memref<8x128xf32, #tpu.memory_space<vmem>>, vector<8x128xf32>
      %11 = arith.truncf %10 : vector<8x128xf32> to vector<8x128xbf16>
      %c0_7 = arith.constant 0 : index
      %c0_8 = arith.constant 0 : index
      %12 = vector.load %arg4[%c0_7, %c0_8] : memref<128x128xbf16, #tpu.memory_space<vmem>>, vector<128x128xbf16>
      %cst = arith.constant dense<0.000000e+00> : vector<8x128xf32>
      %13 = tpu.matmul %11, %12, %cst {dimension_numbers = #tpu.dot_dimension_numbers<[1], [1], [0], [0], [0, 0, 1, 0], [], []>} : vector<8x128xbf16>, vector<128x128xbf16>, vector<8x128xf32> -> vector<8x128xf32>
      %14 = arith.addf %9, %13 : vector<8x128xf32>
      %c0_9 = arith.constant 0 : index
      %c0_10 = arith.constant 0 : index
      %15 = vector.load %arg7[%c0_9, %c0_10] : memref<8x128xf32, #tpu.memory_space<vmem>>, vector<8x128xf32>
      tpu.vector_store %arg7[%c0_9, %c0_10], %14 {strides = array<i32>} : memref<8x128xf32, #tpu.memory_space<vmem>>, vector<8x128xf32>,
    } else {
    }
    %c1_i32 = arith.constant 1 : i32
    %3 = arith.cmpi eq, %arg1, %c1_i32 : i32
    %4 = arith.extui %3 : i1 to i32
    %c0_i32_1 = arith.constant 0 : i32
    %5 = arith.cmpi ne, %4, %c0_i32_1 : i32
    scf.if %5 {
      %c0_i32_2 = arith.constant 0 : i32
      %6 = arith.cmpi eq, %arg2, %c0_i32_2 : i32
      %7 = arith.extui %6 : i1 to i32
      %c0_i32_3 = arith.constant 0 : i32
      %8 = arith.cmpi ne, %7, %c0_i32_3 : i32
      scf.if %8 {
        %cst_19 = arith.constant 0xFF800000 : f32
        %36 = vector.broadcast %cst_19 : f32 to vector<8x1xf32>
        %c0_20 = arith.constant 0 : index
        %c0_21 = arith.constant 0 : index
        %37 = vector.load %arg8[%c0_20, %c0_21] : memref<8x1xf32, #tpu.memory_space<vmem>>, vector<8x1xf32>
        tpu.vector_store %arg8[%c0_20, %c0_21], %36 {strides = array<i32>} : memref<8x1xf32, #tpu.memory_space<vmem>>, vector<8x1xf32>,
        %cst_22 = arith.constant 0.000000e+00 : f32
        %38 = vector.broadcast %cst_22 : f32 to vector<8x1xf32>
        %c0_23 = arith.constant 0 : index
        %c0_24 = arith.constant 0 : index
        %39 = vector.load %arg9[%c0_23, %c0_24] : memref<8x1xf32, #tpu.memory_space<vmem>>, vector<8x1xf32>
        tpu.vector_store %arg9[%c0_23, %c0_24], %38 {strides = array<i32>} : memref<8x1xf32, #tpu.memory_space<vmem>>, vector<8x1xf32>,
      } else {
      }
      %c0 = arith.constant 0 : index
      %c0_4 = arith.constant 0 : index
      %9 = vector.load %arg7[%c0, %c0_4] : memref<8x128xf32, #tpu.memory_space<vmem>>, vector<8x128xf32>
      %10 = arith.truncf %9 : vector<8x128xf32> to vector<8x128xbf16>
      %c0_5 = arith.constant 0 : index
      %c0_6 = arith.constant 0 : index
      %11 = vector.load %arg5[%c0_5, %c0_6] : memref<128x128xbf16, #tpu.memory_space<vmem>>, vector<128x128xbf16>
      %cst = arith.constant dense<0.000000e+00> : vector<8x128xf32>
      %12 = tpu.matmul %10, %11, %cst {dimension_numbers = #tpu.dot_dimension_numbers<[1], [1], [0], [0], [0, 0, 1, 0], [], []>} : vector<8x128xbf16>, vector<128x128xbf16>, vector<8x128xf32> -> vector<8x128xf32>
      %c128_i32 = arith.constant 128 : i32
      %13 = arith.muli %arg2, %c128_i32 : i32
      %14 = tpu.assume_multiple %13, 128 : i32
      %c0_7 = arith.constant 0 : index
      %15 = arith.index_cast %14 : i32 to index
      %16 = vector.load %arg6[%c0_7, %15] : memref<8x512xf32, #tpu.memory_space<vmem>>, vector<8x128xf32>
      tpu.vector_store %arg6[%c0_7, %15], %12 {strides = array<i32>} : memref<8x512xf32, #tpu.memory_space<vmem>>, vector<8x128xf32>,
      %c0_8 = arith.constant 0 : index
      %c0_9 = arith.constant 0 : index
      %17 = vector.load %arg8[%c0_8, %c0_9] : memref<8x1xf32, #tpu.memory_space<vmem>>, vector<8x1xf32>
      %cst_10 = arith.constant dense<0xFF800000> : vector<8xf32>
      %18 = vector.multi_reduction <maximumf>, %12, %cst_10 [1] : vector<8x128xf32> to vector<8xf32>
      %19 = vector.shape_cast %18 : vector<8xf32> to vector<8x1xf32>
      %20 = arith.maximumf %17, %19 : vector<8x1xf32>
      %c0_11 = arith.constant 0 : index
      %c0_12 = arith.constant 0 : index
      %21 = vector.load %arg9[%c0_11, %c0_12] : memref<8x1xf32, #tpu.memory_space<vmem>>, vector<8x1xf32>
      %22 = arith.subf %17, %20 : vector<8x1xf32>
      %23 = math.exp %22 : vector<8x1xf32>
      %24 = arith.mulf %21, %23 : vector<8x1xf32>
      %25 = vector.broadcast %20 : vector<8x1xf32> to vector<8x128xf32>
      %26 = arith.subf %12, %25 : vector<8x128xf32>
      %27 = math.exp %26 : vector<8x128xf32>
      %cst_13 = arith.constant dense<0.000000e+00> : vector<8xf32>
      %28 = vector.multi_reduction <add>, %27, %cst_13 [1] : vector<8x128xf32> to vector<8xf32>
      %29 = vector.shape_cast %28 : vector<8xf32> to vector<8x1xf32>
      %30 = arith.addf %24, %29 : vector<8x1xf32>
      %c0_14 = arith.constant 0 : index
      %c0_15 = arith.constant 0 : index
      %31 = vector.load %arg9[%c0_14, %c0_15] : memref<8x1xf32, #tpu.memory_space<vmem>>, vector<8x1xf32>
      tpu.vector_store %arg9[%c0_14, %c0_15], %30 {strides = array<i32>} : memref<8x1xf32, #tpu.memory_space<vmem>>, vector<8x1xf32>,
      %c0_16 = arith.constant 0 : index
      %c0_17 = arith.constant 0 : index
      %32 = vector.load %arg8[%c0_16, %c0_17] : memref<8x1xf32, #tpu.memory_space<vmem>>, vector<8x1xf32>
      tpu.vector_store %arg8[%c0_16, %c0_17], %20 {strides = array<i32>} : memref<8x1xf32, #tpu.memory_space<vmem>>, vector<8x1xf32>,
      %c3_i32 = arith.constant 3 : i32
      %33 = arith.cmpi eq, %arg2, %c3_i32 : i32
      %34 = arith.extui %33 : i1 to i32
      %c0_i32_18 = arith.constant 0 : i32
      %35 = arith.cmpi ne, %34, %c0_i32_18 : i32
      scf.if %35 {
        %c0_19 = arith.constant 0 : index
        %c0_20 = arith.constant 0 : index
        %36 = vector.load %arg8[%c0_19, %c0_20] : memref<8x1xf32, #tpu.memory_space<vmem>>, vector<8x1xf32>
        %c0_21 = arith.constant 0 : index
        %c0_22 = arith.constant 0 : index
        %37 = vector.load %arg9[%c0_21, %c0_22] : memref<8x1xf32, #tpu.memory_space<vmem>>, vector<8x1xf32>
        %38 = math.log %37 : vector<8x1xf32>
        %39 = arith.addf %36, %38 : vector<8x1xf32>
        %c0_23 = arith.constant 0 : index
        %c0_24 = arith.constant 0 : index
        %40 = vector.load %arg6[%c0_23, %c0_24] : memref<8x512xf32, #tpu.memory_space<vmem>>, vector<8x512xf32>
        %41 = vector.broadcast %39 : vector<8x1xf32> to vector<8x512xf32>
        %42 = arith.subf %40, %41 : vector<8x512xf32>
        %43 = math.exp %42 : vector<8x512xf32>
        %c0_25 = arith.constant 0 : index
        %c0_26 = arith.constant 0 : index
        %44 = vector.load %arg6[%c0_25, %c0_26] : memref<8x512xf32, #tpu.memory_space<vmem>>, vector<8x512xf32>
        tpu.vector_store %arg6[%c0_25, %c0_26], %43 {strides = array<i32>} : memref<8x512xf32, #tpu.memory_space<vmem>>, vector<8x512xf32>,
      } else {
      }
    } else {
    }
    return
  }
  func.func @transform_0(%arg0: i32, %arg1: i32, %arg2: i32) -> (i32, i32) {
    %c1_i32 = arith.constant 1 : i32
    %0 = arith.subi %c1_i32, %arg1 : i32
    %1 = arith.muli %0, %arg2 : i32
    %c0_i32 = arith.constant 0 : i32
    return %arg0, %1 : i32, i32
  }
  func.func @transform_1(%arg0: i32, %arg1: i32, %arg2: i32) -> (i32, i32) {
    %c1_i32 = arith.constant 1 : i32
    %0 = arith.subi %c1_i32, %arg1 : i32
    %1 = arith.muli %0, %arg2 : i32
    %c0_i32 = arith.constant 0 : i32
    %c0_i32_0 = arith.constant 0 : i32
    return %c0_i32, %1 : i32, i32
  }
  func.func @transform_2(%arg0: i32, %arg1: i32, %arg2: i32) -> (i32, i32) {
    %0 = arith.muli %arg1, %arg2 : i32
    %c0_i32 = arith.constant 0 : i32
    %c0_i32_0 = arith.constant 0 : i32
    return %0, %c0_i32 : i32, i32
  }
  func.func @transform_3(%arg0: i32, %arg1: i32, %arg2: i32) -> (i32, i32) {
    %c0_i32 = arith.constant 0 : i32
    %c0_i32_0 = arith.constant 0 : i32
    return %arg0, %c0_i32 : i32, i32
  }
}

</mosaic_0001>

<bundles_post_ra>
// kernel: tpu_custom_call.1
= control target key start
LH: loop header
LB: loop body
LE: loop exit
PB: predicated region body
PF: predicated region fallthrough
CT: control target
= control target key end

     0   :  { %s1577_s0 = inlined_call_operand.hbm [shape: f32[8,512], index: 0, kind: input, shape index: {}]   ;;  %s1578_s1 = inlined_call_operand.hbm [shape: bf16[128,512], index: 1, kind: input, shape index: {}]   ;;  %s1579_s2 = inlined_call_operand.hbm [shape: bf16[512,128], index: 2, kind: input, shape index: {}]   ;;  %s1580_s3 = inlined_call_operand.hbm [shape: f32[8,512], index: 3, kind: output, shape index: {}]  }
   0x1   :  { %1593 = sst [smem:[#allocation21_spill]] %s1577_s0 }
   0x2   :  { %1594 = sst [smem:[#allocation22_spill]] %s1578_s1 }
   0x3   :  { %1595 = sst [smem:[#allocation23_spill]] %s1580_s3 }
   0x4   :  { %8 = vsyncpa [#allocation6], 0 }
   0x5   :  { %10 = vsyncpa [#allocation6 + $0x1], 0 }
   0x6   :  { %11 = vsyncpa [#allocation9], 0 }
   0x7   :  { %13 = vsyncpa [#allocation9 + $0x1], 0 }
   0x8   :  { %14 = vsyncpa [#allocation7], 0  ;;  %s1234_s12 = smov 0   ;;  %s1236_s13 = smov 0  }
   0x9   :  { %s1238_s14 = smov 0   ;;  %s1240_s15 = smov 0  }
   0xa   :  { %s1242_s16 = smov 0   ;;  %s1244_s17 = smov 0  }
   0xb   :  { %s1246_s18 = smov 0   ;;  %s1248_s19 = smov 0  }
   0xc   :  { %s1250_s20 = smov 0   ;;  %s1252_s21 = smov 0  }
   0xd   :  { %s1254_s22 = smov 0  }
   0xe LB: > { %1596 = sst [smem:[#allocation16_spill]] %s1180_s18  ;;  %s1288_s23 = sadd.s32 4294967295, %s1196_s22   ;;  %s1196_s22 = sphi %s1254_s22, %s20_s22   ;;  %s1192_s21 = sphi %s1252_s21, %s1634_s21   ;;  %s1188_s20 = sphi %s1250_s20, %s1633_s20   ;;  %s1184_s19 = sphi %s1248_s19, %s1632_s19   ;;  %s1180_s18 = sphi %s1246_s18, %s1624_s18   ;;  %s1176_s17 = sphi %s1244_s17, %s1631_s17   ;;  %s1172_s16 = sphi %s1242_s16, %s1630_s16   ;;  %s1168_s15 = sphi %s1240_s15, %s1629_s15   ;;  %s1164_s14 = sphi %s1238_s14, %s1628_s14   ;;  %s1160_s13 = sphi %s1236_s13, %s1627_s13   ;;  %s1156_s12 = sphi %s1234_s12, %s1626_s12  }
   0xf   : > { %1597 = sst [smem:[#allocation17_spill]] %s1184_s19  ;;  %s43_s24 = ssub.s32 1, %s1192_s21 }
  0x10   : > { %1598 = sst [smem:[#allocation18_spill]] %s1188_s20  ;;  %s1292_s25 = smul.u32 %s1188_s20, %s43_s24 }
  0x11   : > { %1599 = sst [smem:[#allocation19_spill]] %s1192_s21  ;;  %p59_p0 = scmp.ne.s32.totalorder %s1176_s17, %s1172_s16 }
  0x12   : > { %p1582_p1 = scmp.eq.s32.totalorder %s1196_s22, 0  ;;  %p65_p2 = scmp.ne.s32.totalorder %s1172_s16, %s1168_s15 }
  0x13   : > { %p1583_p3 = scmp.eq.s32.totalorder %s1288_s23, 0  ;;  %p1581_p6 = scmp.lt.s32.totalorder %s1196_s22, 8 }
  0x14   : > { %p61_p4 = por %p1582_p1, %p59_p0  ;;  %s1309_s27 = sand.u32 1, %s1176_s17  }
  0x15   : > { %p1303_p5 = por %p1583_p3, %p65_p2  ;;  %s195_s28 = sand.u32 1, %s1196_s22  }
  0x16   : > { %p1314_p7 = pnand %p1581_p6, %p61_p4  ;;  %s727_s30 = sshll.u32 %s1309_s27, 6 }
  0x17   : > { %s1600_s26 = scalar_select %p1303_p5, 1, 0 }
  0x18   : > { %s728_s4 = sshll.u32 %s1292_s25, 6  ;;  %s1602_s1 = sld [smem:[#allocation22_spill]] }
  0x19   : > { %s199_s8 = scalar_lea.vmem [#allocation8], %s727_s30  ;;  %s1327_s10 = scalar_lea.sflag [#allocation9], %s195_s28 }
  0x1a   : > { %s207_s9 = sshll.u32 %s199_s8, 4  ;;  %p980_p9 = pneg %p1314_p7  ;;  %s1325_s9 = int_to_ptr.vmem [resolvable:$true] %s207_s9 }
  0x1e   : > { %s1323_s7 = scalar_lea.hbm %s1602_s1, %s728_s4  ;;  %s983_s4 = scalar_lea.hbm %s1602_s1, 4096 }
  0x1f   : > { %s978_s11 = scalar_lea.hbm %s1323_s7, 1024  ;;  %p984_p12 = scmp.lt.u32.totalorder %s1323_s7, %s1602_s1 }
  0x20   : > { %p979_p8 = scmp.ne.s32.totalorder %s1323_s7, %s978_s11  ;;  %p985_p13 = scmp.lt.u32.totalorder %s983_s4, %s978_s11 }
  0x21   : > { %p987_p2 = scmp.lt.u32.totalorder %s978_s11, %s1323_s7 }
  0x22   : > { %p981_p10 = pnand %p980_p9, %p979_p8  ;;  %p986_p0 = por %p985_p13, %p984_p12 }
  0x24   : > { %p982_p11 = pneg %p981_p10  ;;  %p988_p4 = por %p987_p2, %p986_p0 }
  0x26   : > { %p989_p6 = pnand %p988_p4, %p982_p11 }
  0x28   : > { %992 = shalt.err (!%p989_p6)
}
  0x29   : > { %s993_s28 = scalar_lea.vmem %s1325_s9, 1024  ;;  %s1198_s30 = smov [#allocation8]  }
  0x2a   : > { %p994_p8 = scmp.ne.s32.totalorder %s1325_s9, %s993_s28  ;;  %s998_s8 = sshll.u32 %s1198_s30, 4  ;;  %s999_s8 = int_to_ptr.vmem [resolvable:$false] %s998_s8 }
  0x2b   : > { %s1000_s15 = scalar_lea.vmem %s999_s8, 2048  ;;  %p1001_p3 = scmp.lt.s32.totalorder %s1325_s9, %s999_s8 }
  0x2c   : > { %p996_p10 = pnand %p994_p8, %p980_p9  ;;  %p1002_p12 = scmp.lt.s32.totalorder %s1000_s15, %s993_s28 }
  0x2e   : > { %p997_p1 = pneg %p996_p10  ;;  %p1003_p13 = por %p1002_p12, %p1001_p3 }
  0x30   : > { %p1004_p0 = pnand %p1003_p13, %p997_p1 }
  0x32   : > { %1007 = shalt.err (!%p1004_p0)
}
  0x33   : > { %s1199_s11 = smov 256   ;;  %s1585_s24 = smov 64  }
  0x34   : > { %s1587_s4 = smov 4   ;;  %p732_p3 = scmp.ge.s32.totalorder %s1196_s22, 1 }
  0x35   : > { %838 = dma.hbm_to_vmem [thread:$0]  (!%p1314_p7), %s1323_s7, 1024, %s1325_s9, %s1327_s10, %s1199_s11, %s1585_s24, %s1587_s4  }
  0x36   : > { %p237_p1 = scmp.lt.s32.totalorder %s1196_s22, 9  ;;  %s725_s6 = sshll.u32 %s1309_s27, 3 }
  0x37   : > { %s726_s28 = sshll.u32 %s1292_s25, 7  ;;  %s1604_s0 = sld [smem:[#allocation21_spill]] }
  0x38   : > { %p1359_p6 = pnand %p732_p3, %p237_p1  ;;  %s177_s1 = scalar_lea.vmem [#allocation5], %s725_s6 }
  0x39   : > { %s188_s3 = sshll.u32 %s177_s1, 4  ;;  %s174_s7 = scalar_lea.sflag [#allocation6], %s1309_s27  ;;  %s189_s3 = int_to_ptr.vmem [resolvable:$true] %s188_s3 }
  0x3a   : > { %s1603_s5 = scalar_select %p1359_p6, 1, 0 }
  0x3d   : > { %s1368_s15 = scalar_lea.hbm %s1604_s0, %s726_s28  ;;  %s1013_s30 = scalar_lea.hbm %s1604_s0, 512 }
  0x3e   : > { %s1008_s9 = scalar_lea.hbm %s1368_s15, 128  ;;  %p1014_p8 = scmp.lt.u32.totalorder %s1368_s15, %s1604_s0 }
  0x3f   : > { %p1009_p11 = scmp.ne.s32.totalorder %s1368_s15, %s1008_s9  ;;  %p1015_p10 = scmp.lt.u32.totalorder %s1013_s30, %s1008_s9 }
  0x40   : > { %p1017_p13 = scmp.lt.u32.totalorder %s1008_s9, %s1368_s15 }
  0x41   : > { %p1011_p2 = pnand %p1009_p11, %p980_p9  ;;  %p1016_p12 = por %p1015_p10, %p1014_p8 }
  0x43   : > { %p1012_p4 = pneg %p1011_p2  ;;  %p1018_p0 = por %p1017_p13, %p1016_p12 }
  0x45   : > { %p1019_p3 = pnand %p1018_p0, %p1012_p4 }
  0x47   : > { %1022 = shalt.err (!%p1019_p3)
}
  0x48   : > { %s1023_s1 = scalar_lea.vmem %s189_s3, 128  ;;  %s1202_s27 = smov [#allocation5]  }
  0x49   : > { %p1024_p1 = scmp.ne.s32.totalorder %s189_s3, %s1023_s1  ;;  %s1028_s24 = sshll.u32 %s1202_s27, 4  ;;  %s1029_s24 = int_to_ptr.vmem [resolvable:$false] %s1028_s24 }
  0x4a   : > { %s1030_s6 = scalar_lea.vmem %s1029_s24, 256  ;;  %p1031_p5 = scmp.lt.s32.totalorder %s189_s3, %s1029_s24 }
  0x4b   : > { %p1026_p11 = pnand %p1024_p1, %p980_p9  ;;  %p1032_p6 = scmp.lt.s32.totalorder %s1030_s6, %s1023_s1 }
  0x4d   : > { %p1027_p2 = pneg %p1026_p11  ;;  %p1033_p8 = por %p1032_p6, %p1031_p5 }
  0x4f   : > { %p1034_p10 = pnand %p1033_p8, %p1027_p2 }
  0x51   : > { %1037 = shalt.err (!%p1034_p10)
}
  0x52   : > { %835 = dma.hbm_to_vmem [thread:$0]  (!%p1314_p7), %s1368_s15, 128, %s189_s3, %s174_s7  }
  0x53   : > { %s52_s9 = sadd.s32 1, %s1176_s17  ;;  %s32_s11 = sadd.s32 1, %s1188_s20 }
  0x54   : > { %p33_p5 = scmp.ge.s32.totalorder %s32_s11, 4  ;;  %s35_s29 = sadd.s32 1, %s1192_s21 }
  0x55   : > { %s105_s30 = smul.u32 %s1188_s20, %s1192_s21  ;;  %s110_s28 = sadd.s32 1, %s1164_s14 }
  0x56   : > { %s1636_s11 = smov (%p33_p5, %s32_s11), 0  ;;  %s1638_s29 = smov (!%p33_p5, %s35_s29), %s1192_s21 }
  0x57   : > { %p117_p9 = scmp.ne.s32.totalorder %s1164_s14, %s1160_s13  ;;  %p123_p6 = scmp.ne.s32.totalorder %s1160_s13, %s1156_s12 }
  0x58   : > { %p37_p4 = scmp.ge.s32.totalorder %s1638_s29, 2  ;;  %s219_s8 = sand.u32 1, %s1164_s14  }
  0x59   : > { %p1605_p12 = scmp.eq.s32.totalorder %s1288_s23, 0  ;;  %s729_s15 = sshll.u32 %s219_s8, 6 }
  0x5a   : > { %s1640_s29 = smov (%p37_p4, %s1638_s29), 0  ;;  %p1608_p13 = scmp.eq.s32.totalorder %s1196_s22, 0 }
  0x5b   : > { %p1406_p7 = por %p123_p6, %p1605_p12  ;;  %s763_s12 = sshll.u32 %s105_s30, 10 }
  0x5c   : > { %p1414_p0 = por %p117_p9, %p1608_p13  ;;  %s45_s1 = ssub.s32 1, %s1640_s29 }
  0x5d   : > { %s1606_s3 = scalar_select %p1406_p7, 1, 0 }
  0x5e   : > { %s106_s27 = smul.u32 %s1640_s29, %s1636_s11  ;;  %s1425_s8 = scalar_lea.hbm %s1579_s2, %s763_s12 }
  0x5f   : > { %1607 = sst [smem:[#allocation20_spill]] %s1606_s3  ;;  %s46_s24 = smul.u32 %s45_s1, %s1636_s11 }
  0x60   : > { %s107_s6 = ssub.s32 %s105_s30, %s106_s27  ;;  %s221_s20 = scalar_lea.vmem [#allocation10], %s729_s15 }
  0x61   : > { %s48_s21 = ssub.s32 %s1292_s25, %s46_s24  ;;  %p108_p3 = scmp.eq.s32.totalorder %s107_s6, 0 }
  0x62   : > { %p50_p1 = scmp.eq.s32.totalorder %s48_s21, 0  ;;  %s229_s18 = sshll.u32 %s221_s20, 4  ;;  %s1434_s18 = int_to_ptr.vmem [resolvable:$true] %s229_s18 }
  0x63   : > { %s1429_s19 = scalar_select %p108_p3, %s1164_s14, %s110_s28  }
  0x64   : > { %s1432_s3 = scalar_select %p50_p1, %s1176_s17, %s52_s9  }
  0x65   : > { %p1610_p11 = scmp.lt.s32.totalorder %s1196_s22, 8  ;;  %s1038_s25 = scalar_lea.hbm %s1425_s8, 1024 }
  0x66   : > { %p1039_p8 = scmp.ne.s32.totalorder %s1425_s8, %s1038_s25  ;;  %s1043_s4 = scalar_lea.hbm %s1579_s2, 4096 }
  0x67   : > { %p1440_p2 = pnand %p1610_p11, %p1414_p0  ;;  %p1044_p6 = scmp.lt.u32.totalorder %s1425_s8, %s1579_s2 }
  0x68   : > { %p1045_p4 = scmp.lt.u32.totalorder %s1043_s4, %s1038_s25  ;;  %p1047_p13 = scmp.lt.u32.totalorder %s1038_s25, %s1425_s8 }
  0x69   : > { %p1040_p10 = pneg %p1440_p2 }
  0x6a   : > { %p1046_p12 = por %p1045_p4, %p1044_p6 }
  0x6b   : > { %p1041_p5 = pnand %p1040_p10, %p1039_p8 }
  0x6c   : > { %p1048_p0 = por %p1047_p13, %p1046_p12 }
  0x6d   : > { %p1042_p9 = pneg %p1041_p5 }
  0x6f   : > { %p1049_p3 = pnand %p1048_p0, %p1042_p9 }
  0x71   : > { %1052 = shalt.err (!%p1049_p3)
}
  0x72   : > { %s1053_s28 = scalar_lea.vmem %s1434_s18, 1024  ;;  %s1203_s15 = smov [#allocation10]  }
  0x73   : > { %p1054_p1 = scmp.ne.s32.totalorder %s1434_s18, %s1053_s28  ;;  %s1058_s7 = sshll.u32 %s1203_s15, 4  ;;  %s1059_s7 = int_to_ptr.vmem [resolvable:$false] %s1058_s7 }
  0x74   : > { %s1060_s12 = scalar_lea.vmem %s1059_s7, 2048  ;;  %p1061_p5 = scmp.lt.s32.totalorder %s1434_s18, %s1059_s7 }
  0x75   : > { %p1056_p11 = pnand %p1054_p1, %p1040_p10  ;;  %p1062_p6 = scmp.lt.s32.totalorder %s1060_s12, %s1053_s28 }
  0x77   : > { %p1057_p8 = pneg %p1056_p11  ;;  %p1063_p4 = por %p1062_p6, %p1061_p5 }
  0x79   : > { %p1064_p12 = pnand %p1063_p4, %p1057_p8 }
  0x7b   : > { %1067 = shalt.err (!%p1064_p12)
}
  0x7c   : > { %s1612_s1 = smov 4   ;;  %s1613_s27 = smov 64  }
  0x7d   : > { %841 = dma.hbm_to_vmem [thread:$0]  (!%p1440_p2), %s1425_s8, 1024, %s1434_s18, %s1327_s10, %s1613_s27, %s1613_s27, %s1612_s1  }
  0x7e   : > { %p1614_p10 = scmp.ne.s32.totalorder %s1603_s5, 0 }
  0x7f   : > { %s243_s24 = sand.u32 (!%p1614_p10), 1, %s1172_s16   ;;  %p1615_p9 = scmp.ne.s32.totalorder (!%p1614_p10), %s1600_s26, 0 }
  0x80   : > { %241 = sbr.rel (%p1614_p10) target bundleno = 1376 (0x560), region = 32  ;;  %s733_s6 = sshll.u32 (!%p1614_p10), %s243_s24, 3 }
  0x81   : > { %s244_s25 = scalar_lea.sflag (!%p1614_p10), [#allocation6], %s243_s24  ;;  %s1476_s20 = scalar_lea.vmem (!%p1614_p10), [#allocation5], %s733_s6 }
  0x87   : > { %1139 = dma.done.wait (%p1615_p9), %s244_s25, 128  }
  0x88   : > { %1141 = vsyncadd (%p1615_p9), %s244_s25, 4294967168  ;;  %s252_s0 = sand.u32 1, %s1288_s23   ;;  %s734_s21 = sshll.u32 %s243_s24, 6 }
  0x89   : > { %s253_s18 = scalar_lea.sflag [#allocation9], %s252_s0  ;;  %s1483_s10 = scalar_lea.vmem [#allocation8], %s734_s21 }
  0x8a   : > { %1143 = dma.done.wait (%p1615_p9), %s253_s18, 1024  }
  0x8b   : > { %1145 = vsyncadd (%p1615_p9), %s253_s18, 4294966272  ;;  %s263_s8 = sand.u32 1, %s1160_s13  }
  0x8c   : > { %s735_s4 = sshll.u32 %s263_s8, 6 }
  0x8d   : > { %s1490_s9 = scalar_lea.vmem [#allocation10], %s735_s4 }
  0x8e   : > { %1147 = dma.done.wait (%p1406_p7), %s253_s18, 1024  }
  0x8f   : > { %1149 = vsyncadd (%p1406_p7), %s253_s18, 4294966272  ;;  %s1617_s30 = sld [smem:[#allocation17_spill]] }
  0x95   : > { %p736_p2 = scmp.ne.s32.totalorder %s1617_s30, 0 }
  0x96   : > { %s1618_s28 = sld [smem:[#allocation16_spill]] (!%p736_p2) }
  0x97   : > { %303 = sbr.rel (%p736_p2) target bundleno = 445 (0x1bd), region = 48 }
  0x9c   : > { %p737_p13 = scmp.ne.s32.totalorder (!%p736_p2), %s1618_s28, 0 }
  0x9e   : > { %307 = sbr.rel (%p737_p13) target bundleno = 165 (0xa5), region = 52  ;;  %v1204_v0 = vmov (!%p737_p13), 0.0  }
  0x9f   : > { %308 = vst [vmem:[#allocation2] sm:$0xff] (!%p737_p13), %v1204_v0 }
  0xa5 PF: > { %v946_v1 = vld [vmem:[%s1483_s10] sm:$0xff]   ;;  %v1205_v2 = vmov 0.0   ;;  %vm1206_vm0 = vmmov 0   ;;  %v947_v3 = vld [vmem:[%s1483_s10 + $0x8] sm:$0xff]   ;;  %v948_v4 = vld [vmem:[%s1483_s10 + $0x10] sm:$0xff]  }
  0xa6   : > { %782 = vmatprep.subr.bf16.mxu0 %v1205_v2  ;;  %798 = vmatprep.mubr.msk.bf16.mxu0 %vm1206_vm0, %v1205_v2  ;;  %v949_v5 = vld [vmem:[%s1483_s10 + $0x18] sm:$0xff]   ;;  %v950_v6 = vld [vmem:[%s1483_s10 + $0x20] sm:$0xff]   ;;  %v951_v7 = vld [vmem:[%s1483_s10 + $0x28] sm:$0xff]  }
  0xa7   : > { %783 = vmatpush3.bf16.xpose.msra.mxu0 %v946_v1  ;;  %v952_v8 = vld [vmem:[%s1483_s10 + $0x30] sm:$0xff]   ;;  %v953_v9 = vld [vmem:[%s1483_s10 + $0x38] sm:$0xff]  }
  0xa8   : > { %784 = vmatprep.subr.bf16.mxu0 %v1205_v2  ;;  %v310_v10 = vld [vmem:[%s1476_s20] sm:$0xff] }
  0xa9   : > { %v311_v11 = vpack.c.bf16 %v310_v10, %v310_v10  ;;  %v309_v12 = vld [vmem:[#allocation2] sm:$0xff] }
  0xaf   : > { %785 = vmatpush3.bf16.xpose.msra.mxu0 %v947_v3 }
  0xb0   : > { %786 = vmatprep.subr.bf16.mxu0 %v1205_v2 }
  0xb7   : > { %787 = vmatpush3.bf16.xpose.msra.mxu0 %v948_v4 }
  0xb8   : > { %788 = vmatprep.subr.bf16.mxu0 %v1205_v2 }
  0xbf   : > { %789 = vmatpush3.bf16.xpose.msra.mxu0 %v949_v5 }
  0xc0   : > { %790 = vmatprep.subr.bf16.mxu0 %v1205_v2 }
  0xc7   : > { %791 = vmatpush3.bf16.xpose.msra.mxu0 %v950_v6 }
  0xc8   : > { %792 = vmatprep.subr.bf16.mxu0 %v1205_v2 }
  0xcf   : > { %793 = vmatpush3.bf16.xpose.msra.mxu0 %v951_v7 }
  0xd0   : > { %794 = vmatprep.subr.bf16.mxu0 %v1205_v2 }
  0xd7   : > { %795 = vmatpush3.bf16.xpose.msra.mxu0 %v952_v8 }
  0xd8   : > { %796 = vmatprep.subr.bf16.mxu0 %v1205_v2 }
  0xdf   : > { %797 = vmatpush3.bf16.xpose.msra.mxu0 %v953_v9 }
  0xe6   : > { %799 = vmatmul.mubr.bf16.vlgmr.msra.gmra.mrb[0].mxu0 %v311_v11 }
 0x1b9   : > { %v410_v13 = vpop.f32.mrb[0].mxu0 }
 0x1ba   : > { %v416_v14 = vadd.f32 %v410_v13, %v309_v12  ;;  %v800_v15 = vpop.f32.mrb[1].mxu0 }
 0x1bb   : > { %v413_v16 = vpop.f32.mrb[2].mxu0 }
 0x1bc   : > { %417 = vst [vmem:[#allocation2] sm:$0xff] %v416_v14  ;;  %v801_v17 = vpop.f32.mrb[3].mxu0 }
 0x1bd PF: > { %s1619_s26 = sld [smem:[#allocation17_spill]] }
 0x1c3   : > { %p746_p7 = scmp.ne.s32.totalorder %s1619_s26, 1 }
 0x1c4   : > { %s1620_s15 = sld [smem:[#allocation16_spill]] (!%p746_p7) }
 0x1c5   : > { %421 = sbr.rel (%p746_p7) target bundleno = 1345 (0x541), region = 56 }
 0x1ca   : > { %p747_p0 = scmp.ne.s32.totalorder (!%p746_p7), %s1620_s15, 0 }
 0x1cc   : > { %425 = sbr.rel (%p747_p0) target bundleno = 467 (0x1d3), region = 60  ;;  %vm426_vm1 = vcmask (!%p747_p0), 7168   ;;  %v1207_v18 = vmov (!%p747_p0), -inf   ;;  %v1208_v19 = vmov (!%p747_p0), 0.0  }
 0x1cd   : > { %427 = vst.msk [vmem:[#allocation3] sm:$0xff] (!%p747_p0), %vm426_vm1, %v1207_v18  ;;  %428 = vst.msk [vmem:[#allocation4] sm:$0xff] (!%p747_p0), %vm426_vm1, %v1208_v19 }
 0x1d3 PF: > { %v955_v20 = vld [vmem:[%s1490_s9] sm:$0xff]   ;;  %v1209_v21 = vmov 0.0   ;;  %vm1210_vm2 = vmmov 0   ;;  %v956_v22 = vld [vmem:[%s1490_s9 + $0x8] sm:$0xff]   ;;  %v957_v23 = vld [vmem:[%s1490_s9 + $0x10] sm:$0xff]   ;;  %s1621_s7 = sld [smem:[#allocation16_spill]] }
 0x1d4   : > { %802 = vmatprep.subr.bf16.mxu0 %v1209_v21  ;;  %818 = vmatprep.mubr.msk.bf16.mxu0 %vm1210_vm2, %v1209_v21  ;;  %v958_v24 = vld [vmem:[%s1490_s9 + $0x18] sm:$0xff]   ;;  %v959_v25 = vld [vmem:[%s1490_s9 + $0x20] sm:$0xff]   ;;  %v960_v26 = vld [vmem:[%s1490_s9 + $0x28] sm:$0xff]   ;;  %v1211_v35 = vmov 0   ;;  %vm561_vm3 = vcmask 7168  }
 0x1d5   : > { %803 = vmatpush3.bf16.xpose.msra.mxu0 %v955_v20  ;;  %v961_v27 = vld [vmem:[%s1490_s9 + $0x30] sm:$0xff]   ;;  %v962_v28 = vld [vmem:[%s1490_s9 + $0x38] sm:$0xff]   ;;  %954 = vset.pattern.permute.xlu0 %v1211_v35  ;;  %v541_v36 = vld [vmem:[#allocation3] sm:$0xff] }
 0x1d6   : > { %804 = vmatprep.subr.bf16.mxu0 %v1209_v21  ;;  %v429_v29 = vld [vmem:[#allocation2] sm:$0xff]  ;;  %v545_v46 = vld [vmem:[#allocation4] sm:$0xff] }
 0x1d7   : > { %v430_v30 = vpack.c.bf16 %v429_v29, %v429_v29 }
 0x1d9   : > { %s756_s12 = sshll.u32 %s1621_s7, 7  ;;  %p758_p3 = scmp.ne.s32.totalorder %s1621_s7, 3 }
 0x1da   : > { %s536_s1 = sshra.s32 %s756_s12, 7  ;;  %v1212_v51 = vmov (!%p758_p3), 0  }
 0x1db   : > { %s757_s27 = sshll.u32 %s536_s1, 3 }
 0x1dc   : > { %s539_s24 = scalar_lea.vmem [#allocation11], %s757_s27 }
 0x1dd   : > { %805 = vmatpush3.bf16.xpose.msra.mxu0 %v956_v22 }
 0x1de   : > { %806 = vmatprep.subr.bf16.mxu0 %v1209_v21 }
 0x1e5   : > { %807 = vmatpush3.bf16.xpose.msra.mxu0 %v957_v23 }
 0x1e6   : > { %808 = vmatprep.subr.bf16.mxu0 %v1209_v21 }
 0x1ed   : > { %809 = vmatpush3.bf16.xpose.msra.mxu0 %v958_v24 }
 0x1ee   : > { %810 = vmatprep.subr.bf16.mxu0 %v1209_v21 }
 0x1f5   : > { %811 = vmatpush3.bf16.xpose.msra.mxu0 %v959_v25 }
 0x1f6   : > { %812 = vmatprep.subr.bf16.mxu0 %v1209_v21 }
 0x1fd   : > { %813 = vmatpush3.bf16.xpose.msra.mxu0 %v960_v26 }
 0x1fe   : > { %814 = vmatprep.subr.bf16.mxu0 %v1209_v21 }
 0x205   : > { %815 = vmatpush3.bf16.xpose.msra.mxu0 %v961_v27 }
 0x206   : > { %816 = vmatprep.subr.bf16.mxu0 %v1209_v21 }
 0x20d   : > { %817 = vmatpush3.bf16.xpose.msra.mxu0 %v962_v28 }
 0x214   : > { %819 = vmatmul.mubr.bf16.vlgmr.msra.gmra.mrb[0].mxu0 %v430_v30 }
 0x2e7   : > { %v529_v31 = vpop.f32.mrb[0].mxu0 }
 0x2e8   : > { %540 = vst [vmem:[%s539_s24] sm:$0xff] %v529_v31  ;;  %542 = vmax.xlane.f32.xlu0 %v529_v31  ;;  %v820_v32 = vpop.f32.mrb[1].mxu0 }
 0x2e9   : > { %v532_v33 = vpop.f32.mrb[2].mxu0 }
 0x2ea   : > { %v821_v34 = vpop.f32.mrb[3].mxu0 }
 0x2ef   : > { %v573_v56 = vld [vmem:[#allocation11] sm:$0xff] (!%p758_p3)  ;;  %v574_v57 = vld [vmem:[#allocation11 + $0x8] sm:$0xff] (!%p758_p3)  ;;  %v575_v58 = vld [vmem:[#allocation11 + $0x10] sm:$0xff] (!%p758_p3) }
 0x2f0   : > { %v576_v59 = vld [vmem:[#allocation11 + $0x18] sm:$0xff] (!%p758_p3) }
 0x375   : > { %v543_v37 = vpop.xlane.xlu0 %542 }
 0x376   : > { %v544_v38 = vmax.f32 %v541_v36, %v543_v37 }
 0x378   : > { %v546_v39 = vsub.f32 %v541_v36, %v544_v38  ;;  %563 = vst.msk [vmem:[#allocation3] sm:$0xff] %vm561_vm3, %v544_v38  ;;  %552 = vperm.xlu0 %954, %v544_v38  }
 0x37a   : > { %v547_v44 = vmul.f32 1.442695, %v546_v39 }
 0x37c   : > { %967 = vset.pattern.permute.xlu0 (!%p758_p3), %v1212_v51 }
 0x37f   : > { %v568_v53 = vld [vmem:[#allocation3] sm:$0xff] (!%p758_p3) }
 0x3f7   : > { %v553_v40 = vpop.permute.xlu0 %552 }
 0x3f8   : > { %v555_v41 = vsub.f32 %v529_v31, %v553_v40 }
 0x3fa   : > { %v556_v42 = vmul.f32 1.442695, %v555_v41 }
 0x3fc   : > { %963 = vpow2.f32 %v556_v42 }
 0x3fd   : > { %965 = vpow2.f32 %v547_v44 }
 0x406   : > { %v964_v43 = vpop.eup %963 }
 0x407   : > { %558 = vadd.xlane.f32.xlu1 %v964_v43  ;;  %v966_v45 = vpop.eup %965 }
 0x408   : > { %v549_v47 = vmul.f32 %v966_v45, %v545_v46 }
 0x491   : > { %567 = sbr.rel (%p758_p3) target bundleno = 1345 (0x541), region = 64 }
 0x494   : > { %v559_v48 = vpop.xlane.xlu1 %558 }
 0x495   : > { %v560_v49 = vadd.f32 %v559_v48, %v549_v47 }
 0x497   : > { %562 = vst.msk [vmem:[#allocation4] sm:$0xff] %vm561_vm3, %v560_v49 }
 0x49e   : > { %v569_v50 = vld [vmem:[#allocation4] sm:$0xff] }
 0x49f   : > { %968 = vlog2.f32 %v569_v50 }
 0x4a9   : > { %v969_v52 = vpop.eup %968 }
 0x4aa   : > { %v571_v54 = vmul.f32 0.6931472, %v969_v52 }
 0x4ac   : > { %v572_v55 = vadd.f32 %v571_v54, %v568_v53 }
 0x4ae   : > { %579 = vperm.xlu0 %967, %v572_v55  }
 0x52d   : > { %v580_v60 = vpop.permute.xlu0 %579 }
 0x52e   : > { %v582_v61 = vsub.f32 %v573_v56, %v580_v60  ;;  %v583_v62 = vsub.f32 %v574_v57, %v580_v60  ;;  %v584_v63 = vsub.f32 %v575_v58, %v580_v60  ;;  %v585_v0 = vsub.f32 %v576_v59, %v580_v60 }
 0x530   : > { %v586_v1 = vmul.f32 1.442695, %v582_v61  ;;  %v588_v2 = vmul.f32 1.442695, %v583_v62  ;;  %v590_v3 = vmul.f32 1.442695, %v584_v63 }
 0x531   : > { %v592_v4 = vmul.f32 1.442695, %v585_v0 }
 0x532   : > { %970 = vpow2.f32 %v586_v1 }
 0x533   : > { %972 = vpow2.f32 %v588_v2 }
 0x534   : > { %974 = vpow2.f32 %v590_v3 }
 0x535   : > { %976 = vpow2.f32 %v592_v4 }
 0x53c   : > { %v971_v5 = vpop.eup %970 }
 0x53d   : > { %v973_v6 = vpop.eup %972  ;;  %594 = vst [vmem:[#allocation11] sm:$0xff] %v971_v5 }
 0x53e   : > { %v975_v7 = vpop.eup %974  ;;  %595 = vst [vmem:[#allocation11 + $0x8] sm:$0xff] %v973_v6 }
 0x53f   : > { %v977_v8 = vpop.eup %976  ;;  %596 = vst [vmem:[#allocation11 + $0x10] sm:$0xff] %v975_v7 }
 0x540   : > { %597 = vst [vmem:[#allocation11 + $0x18] sm:$0xff] %v977_v8 }
 0x541 PF: > { %p843_p1 = scmp.eq.s32.totalorder %s1288_s23, 7  ;;  %s1213_s6 = smov [#allocation11]  }
 0x542   : > { %s608_s25 = sshll.u32 %s1213_s6, 4  ;;  %s609_s25 = int_to_ptr.vmem [resolvable:$true] %s608_s25 }
 0x543   : > { %s1068_s20 = scalar_lea.vmem %s609_s25, 512  ;;  %p1075_p6 = scmp.lt.s32.totalorder %s609_s25, %s609_s25 }
 0x544   : > { %p1069_p11 = scmp.ne.s32.totalorder %s609_s25, %s1068_s20  ;;  %p1076_p4 = scmp.lt.s32.totalorder %s1068_s20, %s1068_s20 }
 0x546   : > { %p1070_p8 = pnand %p1069_p11, %p843_p1  ;;  %p1077_p12 = por %p1076_p4, %p1075_p6 }
 0x548   : > { %p1071_p5 = pneg %p1070_p8 }
 0x54a   : > { %p1078_p10 = pnand %p1077_p12, %p1071_p5 }
 0x54c   : > { %1081 = shalt.err (!%p1078_p10)
}
 0x54d   : > { %s1622_s18 = sld [smem:[#allocation23_spill]] }
 0x553   : > { %s1623_s10 = smov %s1622_s18  ;;  %s1082_s5 = scalar_lea.hbm %s1622_s18, 512 }
 0x554   : > { %p1083_p9 = scmp.ne.s32.totalorder %s1623_s10, %s1082_s5  ;;  %p1088_p7 = scmp.lt.u32.totalorder %s1082_s5, %s1623_s10 }
 0x556   : > { %p1084_p2 = pnand %p1083_p9, %p843_p1 }
 0x558   : > { %p1085_p13 = pneg %p1084_p2 }
 0x55a   : > { %p1090_p0 = pnand %p1088_p7, %p1085_p13 }
 0x55c   : > { %1093 = shalt.err (!%p1090_p0)
}
 0x55d   : > { %829 = dma.vmem_to_hbm [thread:$0]  (%p843_p1), %s609_s25, 512, %s1623_s10, [#allocation7]  }
 0x55e   : > { %1151 = dma.done.wait (%p843_p1), [#allocation7], 512  }
 0x55f   : > { %1153 = vsyncadd (%p843_p1), [#allocation7], 4294966784 }
 0x560 PF: > { %s20_s22 = sadd.s32 1, %s1196_s22   ;;  %s1624_s18 = sld [smem:[#allocation18_spill]] }
 0x561   : > { %p17_p3 = scmp.ge.s32.totalorder %s20_s22, 10   ;;  %s1625_s7 = sld [smem:[#allocation19_spill]] }
 0x562   : > { %s1626_s12 = smov %s1160_s13  ;;  %s1627_s13 = smov %s1164_s14 }
 0x563   : > { %s1628_s14 = smov %s1429_s19  ;;  %s1629_s15 = smov %s1172_s16 }
 0x564   : > { %s1630_s16 = smov %s1176_s17  ;;  %s1631_s17 = smov %s1432_s3 }
 0x565   : > { %s1633_s20 = smov %s1636_s11  ;;  %s1634_s21 = smov %s1640_s29 }
 0x566   :  { %19 = sbr.rel (!%p17_p3) target bundleno = 14 (0xe), region = 115 }
 0x567   : > { %s1632_s19 = smov %s1625_s7 }
 0x56d   :  { %621 = vsyncpa [#allocation6], 1 }
 0x56e   :  { %623 = vsyncpa [#allocation6 + $0x1], 1 }
 0x56f   :  { %624 = vsyncpa [#allocation9], 1 }
 0x570   :  { %626 = vsyncpa [#allocation9 + $0x1], 1 }
 0x571   :  { %627 = vsyncpa [#allocation7], 1 }
 0x572   :  { %629 = vsyncpa [#allocation7 + $0x1], 1 }

</bundles_post_ra>
